<compile_context>
chip_gen: v6e
topology: v6e:2x2x1
jax: 0.10.0
libtpu: 0.0.40
codegen_flags: <defaults>
</compile_context>

<pallas_src>
import functools

import jax
import jax.numpy as jnp
from jax.experimental import pallas as pl
from jax.experimental.pallas import tpu as pltpu

M_IN = 14          # input channels
C_OUT = 16         # conv output channels
K = 5              # conv kernel size
PAD = 2            # conv padding
OUT_SIZE = 7       # final output size
L = 2              # sequence length implied by Linear(16, 7)
F_IN = M_IN * L    # 28 fused input features per sample
OUT_PAD = 8        # output lane padding (8 valid-width slab; sliced to 7)


def _round_up(a, b):
    return (a + b - 1) // b * b


def _cnn_kernel(x_ref, wbig_ref, bc_ref, wl_ref, bl_ref, out_ref):
    """Fused conv1d(as one matmul) + ReLU + maxpool(2) + linear.

    x_ref:    (TM, 28)  raw samples, features indexed as c*2 + l
    wbig_ref: (28, 32)  fused conv weight: lanes [0:16]=pos0, [16:32]=pos1
    bc_ref:   (1, 32)   conv bias duplicated for both positions
    wl_ref:   (16, 8)   linear weight (transposed vs. PyTorch, lane-padded)
    bl_ref:   (1, 8)    linear bias (lane-padded)
    out_ref:  (TM, 8)   output slab; valid lanes [0:7]
    """
    # Both conv output positions in one MXU issue: (TM,28)@(28,32)
    c = jnp.dot(x_ref[...], wbig_ref[...], preferred_element_type=jnp.float32)
    c = jnp.maximum(c + bc_ref[...], 0.0)                       # bias + ReLU
    # MaxPool1d(2) over the two conv output positions -> (TM, 16)
    pooled = jnp.maximum(c[:, :C_OUT], c[:, C_OUT:2 * C_OUT])
    # Linear(16 -> 7), lane-padded to 8
    out = jnp.dot(pooled, wl_ref[...], preferred_element_type=jnp.float32)
    out_ref[...] = (out + bl_ref[...]).astype(out_ref.dtype)


def pack_params(conv_w, conv_b, lin_w, lin_b):
    """Fold the conv into a single (28, 32) weight; pad linear to 8 lanes.

    conv_w (16,14,5), conv_b (16,), lin_w (7,16), lin_b (7,) — PyTorch layouts.
    Call once (or let jit constant-fold it) — hoisted out of the hot path.
    """
    # xpad index of x[:, c, l] is l + PAD; conv pos p uses taps k = l + PAD - p
    #   pos 0: l=0 -> k=2, l=1 -> k=3     pos 1: l=0 -> k=1, l=1 -> k=2
    w_pos0 = jnp.stack([conv_w[:, :, PAD], conv_w[:, :, PAD + 1]], axis=-1)
    w_pos1 = jnp.stack([conv_w[:, :, PAD - 1], conv_w[:, :, PAD]], axis=-1)
    wbig = jnp.concatenate([w_pos0.reshape(C_OUT, F_IN),
                            w_pos1.reshape(C_OUT, F_IN)], axis=0).T   # (28,32)
    bc = jnp.concatenate([conv_b, conv_b]).reshape(1, 2 * C_OUT)      # (1,32)
    wl = jnp.zeros((C_OUT, OUT_PAD), jnp.float32).at[:, :OUT_SIZE].set(lin_w.T)
    bl = jnp.zeros((1, OUT_PAD), jnp.float32).at[:, :OUT_SIZE].set(lin_b)
    return wbig, bc, wl, bl


def cnn_forward(x, conv_w, conv_b, lin_w, lin_b, *, tm=8192):
    """x: (N, 14, 2) float32.  Weights in PyTorch layouts."""
    n = x.shape[0]
    assert x.shape[1] == M_IN and x.shape[2] == L

    wbig, bc, wl, bl = pack_params(conv_w, conv_b, lin_w, lin_b)
    x2 = x.reshape(n, F_IN)                                       # (N, 28)

    # ---- batch tiling ----
    tm_eff = min(tm, _round_up(n, 8))            # multiple of 8 sublanes
    n_pad = _round_up(n, tm_eff)
    if n_pad != n:
        x2 = jnp.pad(x2, ((0, n_pad - n), (0, 0)))
    grid = (n_pad // tm_eff,)

    out = pl.pallas_call(
        _cnn_kernel,
        out_shape=jax.ShapeDtypeStruct((n_pad, OUT_PAD), jnp.float32),
        grid=grid,
        in_specs=[
            pl.BlockSpec((tm_eff, F_IN), lambda i: (i, 0)),           # x tile
            pl.BlockSpec((F_IN, 2 * C_OUT), lambda i: (0, 0)),        # wbig
            pl.BlockSpec((1, 2 * C_OUT), lambda i: (0, 0)),           # bc
            pl.BlockSpec((C_OUT, OUT_PAD), lambda i: (0, 0)),         # wl
            pl.BlockSpec((1, OUT_PAD), lambda i: (0, 0)),             # bl
        ],
        out_specs=pl.BlockSpec((tm_eff, OUT_PAD), lambda i: (i, 0)),
        compiler_params=pltpu.CompilerParams(
            dimension_semantics=("parallel",),    # dual-TC split on v7x
            vmem_limit_bytes=48 << 20),           # headroom on v7x 64 MiB VMEM
    )(x2, wbig, bc, wl, bl)

    # drop batch padding and lane padding, then PyTorch .squeeze()
    # (under jit this slice fuses into the consumer)
    return jnp.squeeze(out[:n, :OUT_SIZE])


def _reference_forward(x, conv_w, conv_b, lin_w, lin_b):
    """Plain-JAX reference mirroring the PyTorch forward pass."""
    xpad = jnp.pad(x, ((0, 0), (0, 0), (PAD, PAD)))
    conv = jnp.stack(
        [jnp.einsum('ncl,ocl->no', xpad[:, :, l:l + K], conv_w) + conv_b
         for l in range(L)],
        axis=-1)                                              # (N, 16, 2)
    conv = jnp.maximum(conv, 0.0)
    pooled = jnp.max(conv, axis=-1)                           # (N, 16)
    out = pooled @ lin_w.T + lin_b                            # (N, 7)
    return jnp.squeeze(out)


if __name__ == "__main__":
    key = jax.random.PRNGKey(0)
    k_x, k_cw, k_cb, k_lw, k_lb = jax.random.split(key, 5)

    # deterministic synthetic parameters (PyTorch-style uniform bounds)
    cw_bound = 1.0 / (M_IN * K) ** 0.5
    conv_w = jax.random.uniform(k_cw, (C_OUT, M_IN, K), jnp.float32,
                                -cw_bound, cw_bound)
    conv_b = jax.random.uniform(k_cb, (C_OUT,), jnp.float32,
                                -cw_bound, cw_bound)
    lw_bound = 1.0 / C_OUT ** 0.5
    lin_w = jax.random.uniform(k_lw, (OUT_SIZE, C_OUT), jnp.float32,
                               -lw_bound, lw_bound)
    lin_b = jax.random.uniform(k_lb, (OUT_SIZE,), jnp.float32,
                               -lw_bound, lw_bound)

    fwd = jax.jit(functools.partial(cnn_forward, tm=8192))

    # small batch (single grid step)
    N = 8
    x = jax.random.normal(k_x, (N, M_IN, L), dtype=jnp.float32)
    y = jax.block_until_ready(fwd(x, conv_w, conv_b, lin_w, lin_b))
    y_ref = _reference_forward(x, conv_w, conv_b, lin_w, lin_b)
    assert y.shape == (N, OUT_SIZE), y.shape
    assert jnp.allclose(y, y_ref, atol=1e-4, rtol=1e-4), "mismatch vs reference"

    # non-multiple-of-8 batch to exercise the padding path
    N2 = 13
    x2 = jax.random.normal(jax.random.PRNGKey(1), (N2, M_IN, L), jnp.float32)
    y2 = jax.block_until_ready(fwd(x2, conv_w, conv_b, lin_w, lin_b))
    y2_ref = _reference_forward(x2, conv_w, conv_b, lin_w, lin_b)
    assert y2.shape == (N2, OUT_SIZE), y2.shape
    assert jnp.allclose(y2, y2_ref, atol=1e-4, rtol=1e-4), "mismatch (padded)"

    print("KERNEL_OK")
</pallas_src>

<mosaic_0001>
module attributes {stable_mosaic.version = 11 : i64} {
  func.func @_cnn_kernel(%arg0: i32, %arg1: memref<8x28xf32, #tpu.memory_space<vmem>>, %arg2: memref<28x32xf32, #tpu.memory_space<vmem>>, %arg3: memref<1x32xf32, #tpu.memory_space<vmem>>, %arg4: memref<16x8xf32, #tpu.memory_space<vmem>>, %arg5: memref<1x8xf32, #tpu.memory_space<vmem>>, %arg6: memref<8x8xf32, #tpu.memory_space<vmem>>) attributes {dimension_semantics = [#tpu.dimension_semantics<parallel>], iteration_bounds = array<i64: 1>, scalar_prefetch = 0 : i64, scratch_operands = 0 : i64, tpu.core_type = #tpu.core_type<tc>, window_params = [{transform_indices = @transform_0, window_bounds = array<i64: 8, 28>}, {pipeline_mode = #tpu.pipeline_mode<synchronous>, transform_indices = @transform_1, window_bounds = array<i64: 28, 32>}, {pipeline_mode = #tpu.pipeline_mode<synchronous>, transform_indices = @transform_2, window_bounds = array<i64: 1, 32>}, {pipeline_mode = #tpu.pipeline_mode<synchronous>, transform_indices = @transform_3, window_bounds = array<i64: 16, 8>}, {pipeline_mode = #tpu.pipeline_mode<synchronous>, transform_indices = @transform_4, window_bounds = array<i64: 1, 8>}, {transform_indices = @transform_5, window_bounds = array<i64: 8, 8>}]} {
    %c0 = arith.constant 0 : index
    %c0_0 = arith.constant 0 : index
    %0 = vector.load %arg1[%c0, %c0_0] : memref<8x28xf32, #tpu.memory_space<vmem>>, vector<8x28xf32>
    %c0_1 = arith.constant 0 : index
    %c0_2 = arith.constant 0 : index
    %1 = vector.load %arg2[%c0_1, %c0_2] : memref<28x32xf32, #tpu.memory_space<vmem>>, vector<28x32xf32>
    %cst = arith.constant dense<0.000000e+00> : vector<8x32xf32>
    %2 = tpu.matmul %0, %1, %cst {dimension_numbers = #tpu.dot_dimension_numbers<[1], [0], [0], [1], [0, 0, 1, 1], [], []>} : vector<8x28xf32>, vector<28x32xf32>, vector<8x32xf32> -> vector<8x32xf32>
    %c0_3 = arith.constant 0 : index
    %c0_4 = arith.constant 0 : index
    %3 = vector.load %arg3[%c0_3, %c0_4] : memref<1x32xf32, #tpu.memory_space<vmem>>, vector<1x32xf32>
    %4 = vector.broadcast %3 : vector<1x32xf32> to vector<8x32xf32>
    %5 = arith.addf %2, %4 : vector<8x32xf32>
    %cst_5 = arith.constant 0.000000e+00 : f32
    %6 = vector.broadcast %cst_5 : f32 to vector<8x32xf32>
    %7 = arith.maximumf %5, %6 : vector<8x32xf32>
    %8 = vector.extract_strided_slice %7 {offsets = [0, 0], sizes = [8, 16], strides = [1, 1]} : vector<8x32xf32> to vector<8x16xf32>
    %9 = vector.extract_strided_slice %7 {offsets = [0, 16], sizes = [8, 16], strides = [1, 1]} : vector<8x32xf32> to vector<8x16xf32>
    %10 = arith.maximumf %8, %9 : vector<8x16xf32>
    %c0_6 = arith.constant 0 : index
    %c0_7 = arith.constant 0 : index
    %11 = vector.load %arg4[%c0_6, %c0_7] : memref<16x8xf32, #tpu.memory_space<vmem>>, vector<16x8xf32>
    %cst_8 = arith.constant dense<0.000000e+00> : vector<8x8xf32>
    %12 = tpu.matmul %10, %11, %cst_8 {dimension_numbers = #tpu.dot_dimension_numbers<[1], [0], [0], [1], [0, 0, 1, 1], [], []>} : vector<8x16xf32>, vector<16x8xf32>, vector<8x8xf32> -> vector<8x8xf32>
    %c0_9 = arith.constant 0 : index
    %c0_10 = arith.constant 0 : index
    %13 = vector.load %arg5[%c0_9, %c0_10] : memref<1x8xf32, #tpu.memory_space<vmem>>, vector<1x8xf32>
    %14 = vector.broadcast %13 : vector<1x8xf32> to vector<8x8xf32>
    %15 = arith.addf %12, %14 : vector<8x8xf32>
    %c0_11 = arith.constant 0 : index
    %c0_12 = arith.constant 0 : index
    %16 = vector.load %arg6[%c0_11, %c0_12] : memref<8x8xf32, #tpu.memory_space<vmem>>, vector<8x8xf32>
    tpu.vector_store %arg6[%c0_11, %c0_12], %15 {strides = array<i32>} : memref<8x8xf32, #tpu.memory_space<vmem>>, vector<8x8xf32>,
    return
  }
  func.func @transform_0(%arg0: i32) -> (i32, i32) {
    %c0_i32 = arith.constant 0 : i32
    %c0_i32_0 = arith.constant 0 : i32
    return %arg0, %c0_i32 : i32, i32
  }
  func.func @transform_1(%arg0: i32) -> (i32, i32) {
    %c0_i32 = arith.constant 0 : i32
    %c0_i32_0 = arith.constant 0 : i32
    %c0_i32_1 = arith.constant 0 : i32
    return %c0_i32, %c0_i32_0 : i32, i32
  }
  func.func @transform_2(%arg0: i32) -> (i32, i32) {
    %c0_i32 = arith.constant 0 : i32
    %c0_i32_0 = arith.constant 0 : i32
    %c0_i32_1 = arith.constant 0 : i32
    return %c0_i32, %c0_i32_0 : i32, i32
  }
  func.func @transform_3(%arg0: i32) -> (i32, i32) {
    %c0_i32 = arith.constant 0 : i32
    %c0_i32_0 = arith.constant 0 : i32
    %c0_i32_1 = arith.constant 0 : i32
    return %c0_i32, %c0_i32_0 : i32, i32
  }
  func.func @transform_4(%arg0: i32) -> (i32, i32) {
    %c0_i32 = arith.constant 0 : i32
    %c0_i32_0 = arith.constant 0 : i32
    %c0_i32_1 = arith.constant 0 : i32
    return %c0_i32, %c0_i32_0 : i32, i32
  }
  func.func @transform_5(%arg0: i32) -> (i32, i32) {
    %c0_i32 = arith.constant 0 : i32
    %c0_i32_0 = arith.constant 0 : i32
    return %arg0, %c0_i32 : i32, i32
  }
}

</mosaic_0001>

<bundles_post_ra>
// kernel: cnn_forward.1
= control target key start
LH: loop header
LB: loop body
LE: loop exit
PB: predicated region body
PF: predicated region fallthrough
CT: control target
= control target key end

     0   :  { %vm37_vm0 = vcmask 1043456   ;;  %v273_v1 = vmov 0.0   ;;  %vm274_vm1 = vmmov 0   ;;  %s337_s0 = inlined_call_operand.vmem [shape: f32[8,28], index: 0, kind: input, shape index: {}]   ;;  %s338_s1 = inlined_call_operand.vmem [shape: f32[28,32], index: 1, kind: input, shape index: {}]   ;;  %s339_s2 = inlined_call_operand.vmem [shape: f32[1,32], index: 2, kind: input, shape index: {}]   ;;  %s340_s3 = inlined_call_operand.vmem [shape: f32[16,8], index: 3, kind: input, shape index: {}]   ;;  %s341_s4 = inlined_call_operand.vmem [shape: f32[1,8], index: 4, kind: input, shape index: {}]   ;;  %s342_s5 = inlined_call_operand.hbm [shape: f32[8,8], index: 5, kind: output, shape index: {}]  }
   0x1   :  { %v25_v0 = vld [vmem:[%s338_s1 + $0x18] sm:$0xf]  ;;  %229 = vmatprep.subr.mxu0 %v273_v1  ;;  %v24_v2 = vld [vmem:[%s338_s1 + $0x10] sm:$0xff]  ;;  %240 = vmatprep.subr.mxu1 %v273_v1 }
   0x2   :  { %230 = vmatpush3.msk.msra.mxu0 %vm37_vm0, %v25_v0  ;;  %237 = vmatprep.mubr.msk.f32.mxu0 %vm274_vm1, %v273_v1 }
   0x3   :  { %10 = vsyncpa [#allocation3], 0  ;;  %231 = vmatprep.subr.mxu0 %v273_v1  ;;  %v23_v3 = vld [vmem:[%s338_s1 + $0x8] sm:$0xff]  ;;  %244 = vmatprep.mubr.msk.f32.mxu1 %vm274_vm1, %v273_v1  ;;  %v22_v4 = vld [vmem:[%s338_s1] sm:$0xff]  ;;  %vm33_vm2 = vcmask 228352   ;;  %vm126_vm3 = vcmask 130048  }
   0x4   :  { %232 = vmatpush3.msra.mxu0 %v24_v2  ;;  %v21_v5 = vld [vmem:[%s337_s0] sm:$0xff]  ;;  %v118_v6 = vld [vmem:[%s340_s3 + $0x8] sm:$0xff]  ;;  %s275_s0 = smov 112   ;;  %vm200_vm4 = vcmask 64512  }
   0x5   :  { %233 = vmatprep.subr.mxu0 %v273_v1  ;;  %241 = vmatpush3.msra.mxu1 %v118_v6  ;;  %v117_v7 = vld [vmem:[%s340_s3] sm:$0xff]  ;;  %s276_s3 = smov [#allocation2]  }
   0x6   :  { %234 = vmatpush3.msra.mxu0 %v23_v3  ;;  %242 = vmatprep.subr.mxu1 %v273_v1  ;;  %v216_v8 = vld [vmem:[%s339_s2] ss:$0 sm:$0xff]  ;;  %s208_s10 = sshll.u32 %s276_s3, 4  ;;  %s209_s10 = int_to_ptr.vmem [resolvable:$true] %s208_s10 }
   0x7   :  { %235 = vmatprep.subr.mxu0 %v273_v1  ;;  %243 = vmatpush3.msra.mxu1 %v117_v7  ;;  %v219_v15 = vld [vmem:[%s341_s4] ss:$0 sm:$0xff]  ;;  %s251_s2 = scalar_lea.vmem %s209_s10, 128  ;;  %p256_p1 = scmp.lt.s32.totalorder %s209_s10, %s209_s10 }
   0x8   :  { %236 = vmatpush3.msra.mxu0 %v22_v4  ;;  %p252_p0 = scmp.ne.s32.totalorder %s209_s10, %s251_s2  ;;  %p257_p2 = scmp.lt.s32.totalorder %s251_s2, %s251_s2 }
   0x9   :  { %238 = vmatmul.mubr.msk.f32.vlgmr.msra.gmra.mxu0 %vm33_vm2, %v21_v5 }
   0xa   :  { %p258_p3 = por %p257_p2, %p256_p1 }
   0xc   :  { %p259_p4 = pnand %p258_p3, %p252_p0 }
  0xc9   :  { %v107_v9 = vpop.f32.mrf.mxu0 }
  0xca   :  { %v108_v10 = vadd.f32 %v216_v8, %v107_v9 }
  0xcb   :  { %v239_v11 = vpop.f32.mrf.mxu0 }
  0xcc   :  { %v111_v12 = vmax.f32 %v108_v10, 0.0 }
  0xce   :  { %113 = vrot.lane.b32.xlu0 %v111_v12, %s275_s0 }
 0x140   :  { %v114_v13 = vpop.permute.xlu0 %113 }
 0x141   :  { %v116_v14 = vmax.f32 %v111_v12, %v114_v13 }
 0x143   :  { %245 = vmatmul.mubr.msk.f32.vlgmr.msra.gmra.mxu1 %vm126_vm3, %v116_v14 }
 0x203   :  { %v196_v16 = vpop.f32.mrf.mxu1 }
 0x204   :  { %v197_v17 = vadd.f32 %v219_v15, %v196_v16 }
 0x205   :  { %v246_v18 = vpop.f32.mrf.mxu1 }
 0x206   :  { %201 = vst.msk [vmem:[#allocation2] sm:$0xff] %vm200_vm4, %v197_v17 }
 0x207   :  { %262 = shalt.err (!%p259_p4)
}
 0x208   :  { %211 = dma.vmem_to_hbm [thread:$0]  %s209_s10, 128, %s342_s5, [#allocation3]  }
 0x209   :  { %271 = dma.done.wait [#allocation3], 128  }
 0x20a   :  { %272 = vsyncadd [#allocation3], 4294967168 }
 0x20b   :  { %215 = vsyncpa [#allocation3], 1 }

</bundles_post_ra>
